<compile_context>
chip_gen: v6e
topology: v6e:2x2x1
jax: 0.10.0
libtpu: 0.0.40
codegen_flags: <defaults>
</compile_context>

<pallas_src>
import functools

import jax
import jax.numpy as jnp
from jax import lax
from jax.experimental import pallas as pl
from jax.experimental.pallas import tpu as pltpu


# TODO(synk): only the measure='cosine' / generic-config path (sim = im @ s.T) is
# implemented; the 'order', SAEM (pdist/pdist_cos) and SCAN (xattn) similarity
# branches of the original module are not translated.


def _round_up(x, m):
    return ((x + m - 1) // m) * m


def _largest_divisor_multiple_of(n, cap, granule):
    """Largest t <= cap with t % granule == 0 and n % t == 0, else None."""
    t = (cap // granule) * granule
    while t >= granule:
        if n % t == 0:
            return t
        t -= granule
    return None


def _pick_tiles(B, tile_m, tile_n):
    """Choose (tm, tn, B_pad) with tm | B_pad, tn | B_pad and TPU-friendly alignment."""
    # First try to tile B exactly; prefer 256-multiples (v6e/v7x MXU native),
    # then 128-multiples, then 8-multiples / full extent.
    if B % 8 == 0:
        tn = (_largest_divisor_multiple_of(B, tile_n, 256)
              or _largest_divisor_multiple_of(B, tile_n, 128)
              or (B if B <= tile_n else None))
        tm = (_largest_divisor_multiple_of(B, tile_m, 256)
              or _largest_divisor_multiple_of(B, tile_m, 128)
              or _largest_divisor_multiple_of(B, tile_m, 8)
              or (B if B <= tile_m else None))
        if tm is not None and tn is not None:
            return tm, tn, B
    # Otherwise pad B up to a multiple of 128 and pick 128-aligned tiles that
    # divide the padded batch (128 always works, so this always succeeds).
    b_pad = _round_up(B, 128)
    cap_n = max(min(tile_n, b_pad), 128)
    cap_m = max(min(tile_m, b_pad), 128)
    tn = (_largest_divisor_multiple_of(b_pad, cap_n, 256)
          or _largest_divisor_multiple_of(b_pad, cap_n, 128))
    tm = (_largest_divisor_multiple_of(b_pad, cap_m, 256)
          or _largest_divisor_multiple_of(b_pad, cap_m, 128))
    return tm, tn, b_pad


def _cap_tiles_for_vmem(tm, tn, D, in_itemsize, budget_bytes=24 * 1024 * 1024):
    """Shrink tiles until the double-buffered working set fits a v7x-safe budget."""
    def est(tm_, tn_):
        tiles = 2 * (tm_ + tn_) * D * in_itemsize   # double-buffered im / s tiles
        temps = 4 * tm_ * tn_ * 4                   # f32 scores + hinge temporaries
        return tiles + temps
    while est(tm, tn) > budget_bytes:
        if tm >= 2 * tn and tm % 16 == 0:
            tm //= 2
        elif tn % 256 == 0 and tn > 128:
            tn //= 2
        elif tm % 16 == 0 and tm > 8:
            tm //= 2
        else:
            break
    return tm, tn


def _contrastive_loss_kernel(im_ref, s_ref, dcol_ref, drow_ref, *refs,
                             margin, max_violation, padded, tm, tn):
    idx = 0
    if padded:
        mcol_ref, mrow_ref = refs[0], refs[1]
        idx = 2
    if max_violation:
        out_row_ref, out_col_ref = refs[idx], refs[idx + 1]
    else:
        out_row_ref = refs[idx]

    i = pl.program_id(0)
    j = pl.program_id(1)

    # (tm, tn) score tile on the MXU: contract D of both operands ('nt' form, no
    # transpose of s); inputs are bf16 (cast once in the wrapper), f32 accumulate.
    scores = lax.dot_general(
        im_ref[...], s_ref[...],
        dimension_numbers=(((1,), (1,)), ((), ())),
        preferred_element_type=jnp.float32)

    d_i = dcol_ref[...]          # (tm, 1): diag values for this row tile
    d_j = drow_ref[...]          # (1, tn): diag values for this column tile

    if padded:
        # Margin vectors are -BIG and diag vectors are +BIG at padded positions,
        # so any cost touching a padded row/column is exactly 0.
        cost_s = jnp.maximum(scores + mcol_ref[...] - d_i, 0.0)   # image -> sentence
        cost_im = jnp.maximum(scores + mrow_ref[...] - d_j, 0.0)  # sentence -> image
    else:
        t = scores + margin                                       # shared hinge offset
        cost_s = jnp.maximum(t - d_i, 0.0)
        cost_im = jnp.maximum(t - d_j, 0.0)

    def _reduce_and_store(cs, ci):
        if max_violation:
            row_max = jnp.max(cs, axis=1, keepdims=True)    # (tm, 1) lane reduce
            col_max = jnp.max(ci, axis=0, keepdims=True)    # (1, tn) sublane reduce

            @pl.when(j == 0)
            def _():
                out_row_ref[...] = row_max

            @pl.when(j > 0)
            def _():
                out_row_ref[...] = jnp.maximum(out_row_ref[...], row_max)

            out_col_ref[0] = col_max                         # this (i, j)'s own block
        else:
            part = jnp.sum(cs + ci, axis=1, keepdims=True)   # single (tm, 1) reduce

            @pl.when(j == 0)
            def _():
                out_row_ref[...] = part

            @pl.when(j > 0)
            def _():
                out_row_ref[...] = out_row_ref[...] + part

    # Zero the diagonal of both cost matrices, but only pay the per-element mask
    # work on tiles that actually intersect the diagonal.
    on_diag = (i * tm < (j + 1) * tn) & (j * tn < (i + 1) * tm)

    @pl.when(on_diag)
    def _():
        row_g = i * tm + lax.broadcasted_iota(jnp.int32, (tm, tn), 0)
        col_g = j * tn + lax.broadcasted_iota(jnp.int32, (tm, tn), 1)
        eye = row_g == col_g
        _reduce_and_store(jnp.where(eye, 0.0, cost_s),
                          jnp.where(eye, 0.0, cost_im))

    @pl.when(jnp.logical_not(on_diag))
    def _():
        _reduce_and_store(cost_s, cost_im)


def contrastive_loss(im, s, margin=0.0, max_violation=False, *,
                     tile_m=512, tile_n=256, use_bf16_matmul=True):
    """Forward pass of ContrastiveLoss (measure='cosine', generic config)."""
    im = jnp.asarray(im, jnp.float32)
    s = jnp.asarray(s, jnp.float32)
    B, D = im.shape

    compute_dtype = jnp.bfloat16 if use_bf16_matmul else jnp.float32
    im_c = im.astype(compute_dtype)
    s_c = s.astype(compute_dtype)

    tm, tn, B_pad = _pick_tiles(B, tile_m, tile_n)
    tm, tn = _cap_tiles_for_vmem(tm, tn, D, jnp.dtype(compute_dtype).itemsize)
    n_i, n_j = B_pad // tm, B_pad // tn
    padded = B_pad != B

    # diag[k] = <im[k], s[k]>, computed once with the same input rounding as the
    # in-kernel matmul path.
    diag = jnp.sum(im_c.astype(jnp.float32) * s_c.astype(jnp.float32), axis=-1)

    if padded:
        big = jnp.float32(1e30)
        pad = B_pad - B
        im_c = jnp.pad(im_c, ((0, pad), (0, 0)))
        s_c = jnp.pad(s_c, ((0, pad), (0, 0)))
        diag_p = jnp.concatenate([diag, jnp.full((pad,), big, jnp.float32)])
        marg_p = jnp.concatenate([jnp.full((B,), jnp.float32(margin)),
                                  jnp.full((pad,), -big, jnp.float32)])
    else:
        diag_p = diag
        marg_p = None

    args = [im_c, s_c, diag_p.reshape(B_pad, 1), diag_p.reshape(1, B_pad)]
    in_specs = [
        pl.BlockSpec((tm, D), lambda i, j: (i, 0)),   # im row tile (resident across j)
        pl.BlockSpec((tn, D), lambda i, j: (j, 0)),   # s row tile (columns of scores)
        pl.BlockSpec((tm, 1), lambda i, j: (i, 0)),   # diag for row tile
        pl.BlockSpec((1, tn), lambda i, j: (0, j)),   # diag for column tile
    ]
    if padded:
        args += [marg_p.reshape(1, B_pad), marg_p.reshape(B_pad, 1)]
        in_specs += [
            pl.BlockSpec((1, tn), lambda i, j: (0, j)),   # margin / -BIG, column tile
            pl.BlockSpec((tm, 1), lambda i, j: (i, 0)),   # margin / -BIG, row tile
        ]

    if max_violation:
        out_shape = (jax.ShapeDtypeStruct((B_pad, 1), jnp.float32),      # row maxes
                     jax.ShapeDtypeStruct((n_i, 1, B_pad), jnp.float32))  # col maxes/row-block
        out_specs = (pl.BlockSpec((tm, 1), lambda i, j: (i, 0)),
                     pl.BlockSpec((1, 1, tn), lambda i, j: (i, 0, j)))
    else:
        out_shape = jax.ShapeDtypeStruct((B_pad, 1), jnp.float32)        # row sums
        out_specs = pl.BlockSpec((tm, 1), lambda i, j: (i, 0))

    kernel = functools.partial(
        _contrastive_loss_kernel,
        margin=float(margin),
        max_violation=bool(max_violation),
        padded=padded, tm=tm, tn=tn)

    outs = pl.pallas_call(
        kernel,
        out_shape=out_shape,
        grid=(n_i, n_j),
        in_specs=in_specs,
        out_specs=out_specs,
        compiler_params=pltpu.CompilerParams(
            dimension_semantics=("parallel", "arbitrary"),
            vmem_limit_bytes=64 * 1024 * 1024),
    )(*args)

    if max_violation:
        row_max, col_max = outs
        # Padded rows/columns are exactly 0 and therefore contribute nothing.
        return jnp.sum(row_max) + jnp.sum(jnp.max(col_max, axis=0))
    return jnp.sum(outs)


def _reference(im, s, margin=0.0, max_violation=False):
    scores = jnp.dot(im, s.T, precision=lax.Precision.HIGHEST)
    diag = jnp.diag(scores)[:, None]
    cost_s = jnp.maximum(margin + scores - diag, 0.0)
    cost_im = jnp.maximum(margin + scores - diag.T, 0.0)
    eye = jnp.eye(scores.shape[0], dtype=bool)
    cost_s = jnp.where(eye, 0.0, cost_s)
    cost_im = jnp.where(eye, 0.0, cost_im)
    if max_violation:
        cost_s = cost_s.max(axis=1)
        cost_im = cost_im.max(axis=0)
    return cost_s.sum() + cost_im.sum()


if __name__ == "__main__":
    key = jax.random.PRNGKey(0)
    k1, k2, k3, k4, k5, k6 = jax.random.split(key, 6)
    margin = 0.2

    def check(loss, ref, rtol, atol, tag):
        loss = jax.block_until_ready(loss)
        ok = bool(jnp.allclose(loss, ref, rtol=rtol, atol=atol))
        assert ok, (tag, float(loss), float(ref))

    # 1) Small single-tile case (original toy shape).
    B, D = 8, 32
    im = jax.random.normal(k1, (B, D), dtype=jnp.float32)
    s = jax.random.normal(k2, (B, D), dtype=jnp.float32)
    im_b = im.astype(jnp.bfloat16).astype(jnp.float32)
    s_b = s.astype(jnp.bfloat16).astype(jnp.float32)
    for mv in (False, True):
        check(contrastive_loss(im, s, margin=margin, max_violation=mv),
              _reference(im_b, s_b, margin, mv), 1e-3, 1e-2, ("small-bf16", mv))
        check(contrastive_loss(im, s, margin=margin, max_violation=mv,
                               use_bf16_matmul=False),
              _reference(im, s, margin, mv), 1e-4, 1e-2, ("small-f32", mv))

    # 2) Tiled 2x2 grid: exercises on/off-diagonal tiles, j-accumulation and the
    #    parallel i axis.
    B2, D2 = 256, 64
    im2 = jax.random.normal(k3, (B2, D2), dtype=jnp.float32)
    s2 = jax.random.normal(k4, (B2, D2), dtype=jnp.float32)
    im2_b = im2.astype(jnp.bfloat16).astype(jnp.float32)
    s2_b = s2.astype(jnp.bfloat16).astype(jnp.float32)
    for mv in (False, True):
        check(contrastive_loss(im2, s2, margin=margin, max_violation=mv,
                               tile_m=128, tile_n=128),
              _reference(im2_b, s2_b, margin, mv), 2e-4, 1e-1, ("tiled-bf16", mv))

    # 3) Batch that is not a multiple of 8: exercises the padding path.
    B3, D3 = 100, 48
    im3 = jax.random.normal(k5, (B3, D3), dtype=jnp.float32)
    s3 = jax.random.normal(k6, (B3, D3), dtype=jnp.float32)
    im3_b = im3.astype(jnp.bfloat16).astype(jnp.float32)
    s3_b = s3.astype(jnp.bfloat16).astype(jnp.float32)
    for mv in (False, True):
        check(contrastive_loss(im3, s3, margin=margin, max_violation=mv),
              _reference(im3_b, s3_b, margin, mv), 1e-3, 1e-1, ("padded-bf16", mv))

    print("KERNEL_OK")
</pallas_src>

<mosaic_0001>
module attributes {stable_mosaic.version = 11 : i64} {
  func.func @_contrastive_loss_kernel(%arg0: i32, %arg1: i32, %arg2: memref<8x32xbf16, #tpu.memory_space<vmem>>, %arg3: memref<8x32xbf16, #tpu.memory_space<vmem>>, %arg4: memref<8x1xf32, #tpu.memory_space<vmem>>, %arg5: memref<1x8xf32, #tpu.memory_space<vmem>>, %arg6: memref<8x1xf32, #tpu.memory_space<vmem>>) attributes {dimension_semantics = [#tpu.dimension_semantics<parallel>, #tpu.dimension_semantics<arbitrary>], iteration_bounds = array<i64: 1, 1>, scalar_prefetch = 0 : i64, scratch_operands = 0 : i64, tpu.core_type = #tpu.core_type<tc>, window_params = [{transform_indices = @transform_0, window_bounds = array<i64: 8, 32>}, {transform_indices = @transform_1, window_bounds = array<i64: 8, 32>}, {transform_indices = @transform_2, window_bounds = array<i64: 8, 1>}, {transform_indices = @transform_3, window_bounds = array<i64: 1, 8>}, {transform_indices = @transform_4, window_bounds = array<i64: 8, 1>}]} {
    %c0 = arith.constant 0 : index
    %c0_0 = arith.constant 0 : index
    %0 = vector.load %arg2[%c0, %c0_0] : memref<8x32xbf16, #tpu.memory_space<vmem>>, vector<8x32xbf16>
    %c0_1 = arith.constant 0 : index
    %c0_2 = arith.constant 0 : index
    %1 = vector.load %arg3[%c0_1, %c0_2] : memref<8x32xbf16, #tpu.memory_space<vmem>>, vector<8x32xbf16>
    %cst = arith.constant dense<0.000000e+00> : vector<8x8xf32>
    %2 = tpu.matmul %0, %1, %cst {dimension_numbers = #tpu.dot_dimension_numbers<[1], [1], [0], [0], [0, 0, 1, 0], [], []>} : vector<8x32xbf16>, vector<8x32xbf16>, vector<8x8xf32> -> vector<8x8xf32>
    %c0_3 = arith.constant 0 : index
    %c0_4 = arith.constant 0 : index
    %3 = vector.load %arg4[%c0_3, %c0_4] : memref<8x1xf32, #tpu.memory_space<vmem>>, vector<8x1xf32>
    %c0_5 = arith.constant 0 : index
    %c0_6 = arith.constant 0 : index
    %4 = vector.load %arg5[%c0_5, %c0_6] : memref<1x8xf32, #tpu.memory_space<vmem>>, vector<1x8xf32>
    %cst_7 = arith.constant 2.000000e-01 : f32
    %5 = vector.broadcast %cst_7 : f32 to vector<8x8xf32>
    %6 = arith.addf %2, %5 : vector<8x8xf32>
    %7 = vector.broadcast %3 : vector<8x1xf32> to vector<8x8xf32>
    %8 = arith.subf %6, %7 : vector<8x8xf32>
    %cst_8 = arith.constant 0.000000e+00 : f32
    %9 = vector.broadcast %cst_8 : f32 to vector<8x8xf32>
    %10 = arith.maximumf %8, %9 : vector<8x8xf32>
    %11 = vector.broadcast %4 : vector<1x8xf32> to vector<8x8xf32>
    %12 = arith.subf %6, %11 : vector<8x8xf32>
    %cst_9 = arith.constant 0.000000e+00 : f32
    %13 = vector.broadcast %cst_9 : f32 to vector<8x8xf32>
    %14 = arith.maximumf %12, %13 : vector<8x8xf32>
    %c8_i32 = arith.constant 8 : i32
    %15 = arith.muli %arg0, %c8_i32 : i32
    %c1_i32 = arith.constant 1 : i32
    %16 = arith.addi %arg1, %c1_i32 : i32
    %c8_i32_10 = arith.constant 8 : i32
    %17 = arith.muli %16, %c8_i32_10 : i32
    %18 = arith.cmpi slt, %15, %17 : i32
    %c8_i32_11 = arith.constant 8 : i32
    %19 = arith.muli %arg1, %c8_i32_11 : i32
    %c1_i32_12 = arith.constant 1 : i32
    %20 = arith.addi %arg0, %c1_i32_12 : i32
    %c8_i32_13 = arith.constant 8 : i32
    %21 = arith.muli %20, %c8_i32_13 : i32
    %22 = arith.cmpi slt, %19, %21 : i32
    %23 = arith.andi %18, %22 : i1
    %24 = arith.extui %23 : i1 to i32
    %c0_i32 = arith.constant 0 : i32
    %25 = arith.cmpi ne, %24, %c0_i32 : i32
    scf.if %25 {
      %c8_i32_15 = arith.constant 8 : i32
      %29 = arith.muli %arg0, %c8_i32_15 : i32
      %30 = tpu.iota {dimensions = array<i32: 0>} : vector<8x8xi32>
      %31 = vector.broadcast %29 : i32 to vector<8x8xi32>
      %32 = arith.addi %31, %30 : vector<8x8xi32>
      %c8_i32_16 = arith.constant 8 : i32
      %33 = arith.muli %arg1, %c8_i32_16 : i32
      %34 = tpu.iota {dimensions = array<i32: 1>} : vector<8x8xi32>
      %35 = vector.broadcast %33 : i32 to vector<8x8xi32>
      %36 = arith.addi %35, %34 : vector<8x8xi32>
      %37 = arith.cmpi eq, %32, %36 : vector<8x8xi32>
      %cst_17 = arith.constant 0.000000e+00 : f32
      %38 = vector.broadcast %cst_17 : f32 to vector<8x8xf32>
      %39 = arith.select %37, %38, %10 : vector<8x8xi1>, vector<8x8xf32>
      %cst_18 = arith.constant 0.000000e+00 : f32
      %40 = vector.broadcast %cst_18 : f32 to vector<8x8xf32>
      %41 = arith.select %37, %40, %14 : vector<8x8xi1>, vector<8x8xf32>
      %42 = arith.addf %39, %41 : vector<8x8xf32>
      %cst_19 = arith.constant dense<0.000000e+00> : vector<8xf32>
      %43 = vector.multi_reduction <add>, %42, %cst_19 [1] : vector<8x8xf32> to vector<8xf32>
      %44 = vector.shape_cast %43 : vector<8xf32> to vector<8x1xf32>
      %c0_i32_20 = arith.constant 0 : i32
      %45 = arith.cmpi eq, %arg1, %c0_i32_20 : i32
      %46 = arith.extui %45 : i1 to i32
      %c0_i32_21 = arith.constant 0 : i32
      %47 = arith.cmpi ne, %46, %c0_i32_21 : i32
      scf.if %47 {
        %c0_24 = arith.constant 0 : index
        %c0_25 = arith.constant 0 : index
        %51 = vector.load %arg6[%c0_24, %c0_25] : memref<8x1xf32, #tpu.memory_space<vmem>>, vector<8x1xf32>
        tpu.vector_store %arg6[%c0_24, %c0_25], %44 {strides = array<i32>} : memref<8x1xf32, #tpu.memory_space<vmem>>, vector<8x1xf32>,
      } else {
      }
      %c0_i32_22 = arith.constant 0 : i32
      %48 = arith.cmpi sgt, %arg1, %c0_i32_22 : i32
      %49 = arith.extui %48 : i1 to i32
      %c0_i32_23 = arith.constant 0 : i32
      %50 = arith.cmpi ne, %49, %c0_i32_23 : i32
      scf.if %50 {
        %c0_24 = arith.constant 0 : index
        %c0_25 = arith.constant 0 : index
        %51 = vector.load %arg6[%c0_24, %c0_25] : memref<8x1xf32, #tpu.memory_space<vmem>>, vector<8x1xf32>
        %52 = arith.addf %51, %44 : vector<8x1xf32>
        %c0_26 = arith.constant 0 : index
        %c0_27 = arith.constant 0 : index
        %53 = vector.load %arg6[%c0_26, %c0_27] : memref<8x1xf32, #tpu.memory_space<vmem>>, vector<8x1xf32>
        tpu.vector_store %arg6[%c0_26, %c0_27], %52 {strides = array<i32>} : memref<8x1xf32, #tpu.memory_space<vmem>>, vector<8x1xf32>,
      } else {
      }
    } else {
    }
    %true = arith.constant true
    %26 = arith.xori %23, %true : i1
    %27 = arith.extui %26 : i1 to i32
    %c0_i32_14 = arith.constant 0 : i32
    %28 = arith.cmpi ne, %27, %c0_i32_14 : i32
    scf.if %28 {
      %29 = arith.addf %10, %14 : vector<8x8xf32>
      %cst_15 = arith.constant dense<0.000000e+00> : vector<8xf32>
      %30 = vector.multi_reduction <add>, %29, %cst_15 [1] : vector<8x8xf32> to vector<8xf32>
      %31 = vector.shape_cast %30 : vector<8xf32> to vector<8x1xf32>
      %c0_i32_16 = arith.constant 0 : i32
      %32 = arith.cmpi eq, %arg1, %c0_i32_16 : i32
      %33 = arith.extui %32 : i1 to i32
      %c0_i32_17 = arith.constant 0 : i32
      %34 = arith.cmpi ne, %33, %c0_i32_17 : i32
      scf.if %34 {
        %c0_20 = arith.constant 0 : index
        %c0_21 = arith.constant 0 : index
        %38 = vector.load %arg6[%c0_20, %c0_21] : memref<8x1xf32, #tpu.memory_space<vmem>>, vector<8x1xf32>
        tpu.vector_store %arg6[%c0_20, %c0_21], %31 {strides = array<i32>} : memref<8x1xf32, #tpu.memory_space<vmem>>, vector<8x1xf32>,
      } else {
      }
      %c0_i32_18 = arith.constant 0 : i32
      %35 = arith.cmpi sgt, %arg1, %c0_i32_18 : i32
      %36 = arith.extui %35 : i1 to i32
      %c0_i32_19 = arith.constant 0 : i32
      %37 = arith.cmpi ne, %36, %c0_i32_19 : i32
      scf.if %37 {
        %c0_20 = arith.constant 0 : index
        %c0_21 = arith.constant 0 : index
        %38 = vector.load %arg6[%c0_20, %c0_21] : memref<8x1xf32, #tpu.memory_space<vmem>>, vector<8x1xf32>
        %39 = arith.addf %38, %31 : vector<8x1xf32>
        %c0_22 = arith.constant 0 : index
        %c0_23 = arith.constant 0 : index
        %40 = vector.load %arg6[%c0_22, %c0_23] : memref<8x1xf32, #tpu.memory_space<vmem>>, vector<8x1xf32>
        tpu.vector_store %arg6[%c0_22, %c0_23], %39 {strides = array<i32>} : memref<8x1xf32, #tpu.memory_space<vmem>>, vector<8x1xf32>,
      } else {
      }
    } else {
    }
    return
  }
  func.func @transform_0(%arg0: i32, %arg1: i32) -> (i32, i32) {
    %c0_i32 = arith.constant 0 : i32
    %c0_i32_0 = arith.constant 0 : i32
    return %arg0, %c0_i32 : i32, i32
  }
  func.func @transform_1(%arg0: i32, %arg1: i32) -> (i32, i32) {
    %c0_i32 = arith.constant 0 : i32
    %c0_i32_0 = arith.constant 0 : i32
    return %arg1, %c0_i32 : i32, i32
  }
  func.func @transform_2(%arg0: i32, %arg1: i32) -> (i32, i32) {
    %c0_i32 = arith.constant 0 : i32
    %c0_i32_0 = arith.constant 0 : i32
    return %arg0, %c0_i32 : i32, i32
  }
  func.func @transform_3(%arg0: i32, %arg1: i32) -> (i32, i32) {
    %c0_i32 = arith.constant 0 : i32
    %c0_i32_0 = arith.constant 0 : i32
    return %c0_i32, %arg1 : i32, i32
  }
  func.func @transform_4(%arg0: i32, %arg1: i32) -> (i32, i32) {
    %c0_i32 = arith.constant 0 : i32
    %c0_i32_0 = arith.constant 0 : i32
    return %arg0, %c0_i32 : i32, i32
  }
}

</mosaic_0001>

<bundles_post_ra>
// kernel: tpu_custom_call.1
= control target key start
LH: loop header
LB: loop body
LE: loop exit
PB: predicated region body
PF: predicated region fallthrough
CT: control target
= control target key end

     0   :  { %vm22_vm0 = vcmask 261120   ;;  %v166_v0 = vmov 0.0   ;;  %vm167_vm1 = vmmov 0   ;;  %v168_v4 = vmov 0   ;;  %s209_s1 = inlined_call_operand.vmem [shape: bf16[8,32], index: 1, kind: input, shape index: {}]   ;;  %s210_s2 = inlined_call_operand.vmem [shape: f32[8,1], index: 2, kind: input, shape index: {}]   ;;  %s211_s0 = inlined_call_operand.vmem [shape: bf16[8,32], index: 0, kind: input, shape index: {}]   ;;  %s212_s3 = inlined_call_operand.vmem [shape: f32[1,8], index: 3, kind: input, shape index: {}]   ;;  %s213_s4 = inlined_call_operand.vmem [shape: f32[8,1], index: 4, kind: output, shape index: {}]  }
   0x1   :  { %156 = vmatprep.subr.bf16.mxu0 %v166_v0  ;;  %v19_v1 = vld [vmem:[%s209_s1] sm:$0xf]  ;;  %158 = vmatprep.mubr.msk.bf16.mxu0 %vm167_vm1, %v166_v0  ;;  %v96_v6 = vlaneseq  ;;  %vm108_vm3 = vcmask 64512   ;;  %vm116_vm4 = vcmask 7168  }
   0x2   :  { %v20_v2 = vld [vmem:[%s210_s2] sm:$0xff]  ;;  %v27_v3 = vsel %vm22_vm0, %v19_v1, 0  ;;  %165 = vset.pattern.permute.xlu0 %v168_v4 }
   0x3   :  { %157 = vmatpush3.bf16.xpose.msra.mxu0 %v27_v3  ;;  %71 = vperm.xlu0 %165, %v20_v2   ;;  %v18_v5 = vld [vmem:[%s211_s0] sm:$0xf]  ;;  %v97_v9 = vshrl.u32 %v96_v6, 7  ;;  %v101_v10 = vand.u32 127, %v96_v6 }
   0x4   :  { %v153_v7 = vld [vmem:[%s212_s3] ss:$0 sm:$0xff] }
   0x5   :  { %vm104_vm2 = vcmp.eq.s32.totalorder %v97_v9, %v101_v10 }
   0xa   :  { %159 = vmatmul.mubr.msk.bf16.vlgmr.msra.gmra.mxu0 %vm22_vm0, %v18_v5 }
  0x7e   :  { %v72_v11 = vpop.permute.xlu0 %71 }
  0xca   :  { %v63_v8 = vpop.f32.mrf.mxu0 }
  0xcb   :  { %v64_v12 = vadd.f32 0.2, %v63_v8 }
  0xcc   :  { %v160_v13 = vpop.f32.mrf.mxu0 }
  0xcd   :  { %v82_v14 = vsub.f32 %v64_v12, %v153_v7  ;;  %v74_v15 = vsub.f32 %v64_v12, %v72_v11 }
  0xce   :  { %v66_v16 = vpop.f32.mrf.mxu0 }
  0xcf   :  { %v83_v17 = vmax.f32 %v82_v14, 0.0  ;;  %v75_v18 = vmax.f32 %v74_v15, 0.0 }
  0xd0   :  { %v161_v19 = vpop.f32.mrf.mxu0 }
  0xd1   :  { %v105_v20 = vsel %vm104_vm2, 0.0, %v75_v18  ;;  %v106_v21 = vsel %vm104_vm2, 0.0, %v83_v17 }
  0xd2   :  { %v107_v22 = vadd.f32 %v106_v21, %v105_v20 }
  0xd4   :  { %v109_v23 = vsel %vm108_vm3, %v107_v22, 0.0 }
  0xd5   :  { %110 = vadd.xlane.f32.xlu0 %v109_v23 }
 0x15e   :  { %v111_v24 = vpop.xlane.xlu0 %110 }
 0x15f   :  { %117 = vst.msk [vmem:[%s213_s4] sm:$0xff] %vm116_vm4, %v111_v24 }

</bundles_post_ra>
